<compile_context>
chip_gen: v6e
topology: v6e:2x2x1
jax: 0.10.0
libtpu: 0.0.40
codegen_flags: <defaults>
</compile_context>

<pallas_src>
import functools

import jax
import jax.numpy as jnp
from jax.experimental import pallas as pl
from jax.experimental.pallas import tpu as pltpu


def _linear3_kernel(factor_ref, w_ref, out_ref, carry_ref, *, rank, scale, t_total, tm):
    # factor_ref: (TM, 2*rank) tile in VMEM ; w_ref: (1, 2*rank) in VMEM
    # out_ref:    (1, 1) f32 accumulator resident in SMEM across the whole grid
    # carry_ref:  (1, 2*rank) f32 VMEM scratch carrying the previous tile's last row
    pid = pl.program_id(0)

    @pl.when(pid == 0)
    def _init():
        out_ref[0, 0] = jnp.float32(0.0)

    f = factor_ref[...].astype(jnp.float32)            # cast after load (bf16-friendly)
    w = w_ref[...].astype(jnp.float32)                 # (1, 2*rank), broadcasts over time

    g0 = pid * tm                                      # global row index of the tile's first row

    # ---- within-tile consecutive diffs: pairs (g0+j, g0+j+1), j = 0 .. TM-2 ----
    ddiff = f[1:, :] - f[:-1, :] - w                   # (TM-1, 2*rank)
    sq = ddiff * ddiff
    s = sq[:, :rank] + sq[:, rank:]                    # |z|^2          (TM-1, rank)
    contrib = s * jnp.sqrt(s)                          # |z|^3 ; sqrt -> EUP slot

    # mask diffs whose second row lies beyond the true T (ragged last tile)
    j = jax.lax.broadcasted_iota(jnp.int32, (tm - 1, 1), 0)
    valid = (g0 + j) < (t_total - 1)
    out_ref[0, 0] += jnp.sum(jnp.where(valid, contrib, 0.0))

    # ---- boundary diff: first row of this tile minus last row of previous tile ----
    @pl.when(pid > 0)
    def _boundary():
        bd = f[0:1, :] - carry_ref[...] - w            # (1, 2*rank)
        bsq = bd * bd
        bs = bsq[:, :rank] + bsq[:, rank:]
        out_ref[0, 0] += jnp.sum(bs * jnp.sqrt(bs))

    # carry this tile's last row to the next grid step
    carry_ref[...] = f[tm - 1:tm, :]

    @pl.when(pid == pl.num_programs(0) - 1)
    def _finalize():
        out_ref[0, 0] = out_ref[0, 0] * jnp.float32(scale)   # weight / (T-1), folded


def linear3_regularizer(factor, w_weight, weight: float, *, tm_max: int = 512):
    """factor: (T, 2*rank) float array ; w_weight: (N, 1) with N >= 2*rank."""
    t, two_rank = factor.shape
    if two_rank % 2 != 0:
        raise ValueError("factor.shape[1] must be even (real/imag halves)")
    rank = two_rank // 2

    if t < 2:
        # TODO(synk): PyTorch yields nan here (empty sum / 0); we return 0 as a guard.
        return jnp.float32(0.0)

    # Glue only: slice + transpose of the tiny drift vector (keeps storage dtype).
    w_row = w_weight[:two_rank].T                       # (1, 2*rank)

    # Tile-row count: biggest multiple of 8 keeping one f32 buffer ~<= 4 MiB so a
    # double-buffered tile + intermediates fits the scoped-VMEM budget on v7x too.
    bytes_per_row = two_rank * 4
    tm_budget = max(8, ((4 * 1024 * 1024) // bytes_per_row) // 8 * 8)
    if t <= max(tm_max, 8) and t <= tm_budget:
        tm = t                                          # single tile: block == full array
    else:
        tm = min(tm_max, tm_budget)                     # multiple of 8 by construction
    grid = (pl.cdiv(t, tm),)
    scale = float(weight) / float(t - 1)

    out = pl.pallas_call(
        functools.partial(_linear3_kernel, rank=rank, scale=scale, t_total=t, tm=tm),
        out_shape=jax.ShapeDtypeStruct((1, 1), jnp.float32),
        grid_spec=pltpu.PrefetchScalarGridSpec(
            num_scalar_prefetch=0,
            grid=grid,
            in_specs=[
                pl.BlockSpec((tm, two_rank), lambda i: (i, 0)),        # factor tile
                pl.BlockSpec((1, two_rank), lambda i: (0, 0)),         # drift row, resident
            ],
            out_specs=pl.BlockSpec((1, 1), lambda i: (0, 0),
                                   memory_space=pltpu.MemorySpace.SMEM),
            scratch_shapes=[pltpu.VMEM((1, two_rank), jnp.float32)],   # carried last row
        ),
        compiler_params=pltpu.CompilerParams(
            dimension_semantics=("arbitrary",),          # sequential reduction over T
            vmem_limit_bytes=40 * 1024 * 1024,
        ),
    )(factor, w_row)
    return out[0, 0]


def _reference(factor, w_weight, weight):
    rank = factor.shape[1] // 2
    ddiff = factor[1:] - factor[:-1] - w_weight[: 2 * rank].T
    diff = jnp.sqrt(ddiff[:, :rank] ** 2 + ddiff[:, rank:] ** 2) ** 3
    return weight * jnp.sum(diff) / (factor.shape[0] - 1)


if __name__ == "__main__":
    key = jax.random.PRNGKey(0)

    def run_case(t, rank, reg_weight, tm_max, k):
        kf, kw = jax.random.split(k)
        factor = jax.random.normal(kf, (t, 2 * rank), dtype=jnp.float32)
        w_weight = jax.random.normal(kw, (2 * rank, 1), dtype=jnp.float32) * 0.1
        out = linear3_regularizer(factor, w_weight, reg_weight, tm_max=tm_max)
        out = jax.block_until_ready(out)
        ref = _reference(factor, w_weight, reg_weight)
        assert jnp.allclose(out, ref, rtol=1e-5, atol=1e-6), (t, rank, out, ref)

    k0, k1, k2 = jax.random.split(key, 3)
    # Module-consistent small shapes: T time embeddings of width 2*rank.
    run_case(8, 16, 0.01, 512, k0)    # single-tile path (T=8, 2*rank=32)
    run_case(64, 16, 0.05, 16, k1)    # multi-tile path: exercises carry + SMEM accumulator
    run_case(50, 16, 0.05, 16, k2)    # ragged last tile: exercises the validity mask

    print("KERNEL_OK")
</pallas_src>

<mosaic_0001>
module attributes {stable_mosaic.version = 11 : i64} {
  func.func @_linear3_kernel(%arg0: i32, %arg1: memref<8x32xf32, #tpu.memory_space<vmem>>, %arg2: memref<1x32xf32, #tpu.memory_space<vmem>>, %arg3: memref<1x1xf32, #tpu.memory_space<smem>>, %arg4: memref<1x32xf32, #tpu.memory_space<vmem>>) attributes {dimension_semantics = [#tpu.dimension_semantics<arbitrary>], iteration_bounds = array<i64: 1>, scalar_prefetch = 0 : i64, scratch_operands = 1 : i64, tpu.core_type = #tpu.core_type<tc>, window_params = [{transform_indices = @transform_0, window_bounds = array<i64: 8, 32>}, {pipeline_mode = #tpu.pipeline_mode<synchronous>, transform_indices = @transform_1, window_bounds = array<i64: 1, 32>}, {transform_indices = @transform_2, window_bounds = array<i64: 1, 1>}]} {
    %c0_i32 = arith.constant 0 : i32
    %0 = arith.cmpi eq, %arg0, %c0_i32 : i32
    %1 = arith.extui %0 : i1 to i32
    %c0_i32_0 = arith.constant 0 : i32
    %2 = arith.cmpi ne, %1, %c0_i32_0 : i32
    scf.if %2 {
      %cst_15 = arith.constant 0.000000e+00 : f32
      %c0_16 = arith.constant 0 : index
      %c0_17 = arith.constant 0 : index
      %41 = memref.load %arg3[%c0_16, %c0_17] : memref<1x1xf32, #tpu.memory_space<smem>>
      memref.store %cst_15, %arg3[%c0_16, %c0_17] : memref<1x1xf32, #tpu.memory_space<smem>>
    } else {
    }
    %c0 = arith.constant 0 : index
    %c0_1 = arith.constant 0 : index
    %3 = vector.load %arg1[%c0, %c0_1] : memref<8x32xf32, #tpu.memory_space<vmem>>, vector<8x32xf32>
    %c0_2 = arith.constant 0 : index
    %c0_3 = arith.constant 0 : index
    %4 = vector.load %arg2[%c0_2, %c0_3] : memref<1x32xf32, #tpu.memory_space<vmem>>, vector<1x32xf32>
    %c8_i32 = arith.constant 8 : i32
    %5 = arith.muli %arg0, %c8_i32 : i32
    %6 = vector.extract_strided_slice %3 {offsets = [1, 0], sizes = [7, 32], strides = [1, 1]} : vector<8x32xf32> to vector<7x32xf32>
    %7 = vector.extract_strided_slice %3 {offsets = [0, 0], sizes = [7, 32], strides = [1, 1]} : vector<8x32xf32> to vector<7x32xf32>
    %8 = arith.subf %6, %7 : vector<7x32xf32>
    %9 = vector.broadcast %4 : vector<1x32xf32> to vector<7x32xf32>
    %10 = arith.subf %8, %9 : vector<7x32xf32>
    %11 = arith.mulf %10, %10 : vector<7x32xf32>
    %12 = vector.extract_strided_slice %11 {offsets = [0, 0], sizes = [7, 16], strides = [1, 1]} : vector<7x32xf32> to vector<7x16xf32>
    %13 = vector.extract_strided_slice %11 {offsets = [0, 16], sizes = [7, 16], strides = [1, 1]} : vector<7x32xf32> to vector<7x16xf32>
    %14 = arith.addf %12, %13 : vector<7x16xf32>
    %15 = math.sqrt %14 : vector<7x16xf32>
    %16 = arith.mulf %14, %15 : vector<7x16xf32>
    %17 = tpu.iota {dimensions = array<i32: 0>} : vector<7x1xi32>
    %18 = vector.broadcast %5 : i32 to vector<7x1xi32>
    %19 = arith.addi %18, %17 : vector<7x1xi32>
    %c7_i32 = arith.constant 7 : i32
    %20 = vector.broadcast %c7_i32 : i32 to vector<7x1xi32>
    %21 = arith.cmpi slt, %19, %20 : vector<7x1xi32>
    %c0_4 = arith.constant 0 : index
    %c0_5 = arith.constant 0 : index
    %22 = memref.load %arg3[%c0_4, %c0_5] : memref<1x1xf32, #tpu.memory_space<smem>>
    %cst = arith.constant 0.000000e+00 : f32
    %23 = vector.shape_cast %21 : vector<7x1xi1> to vector<7x1xi1>
    %24 = vector.broadcast %23 : vector<7x1xi1> to vector<7x16xi1>
    %25 = vector.broadcast %cst : f32 to vector<7x16xf32>
    %26 = arith.select %24, %16, %25 : vector<7x16xi1>, vector<7x16xf32>
    %27 = vector.shape_cast %26 : vector<7x16xf32> to vector<1x7x16xf32>
    %cst_6 = arith.constant dense<0.000000e+00> : vector<1xf32>
    %28 = vector.multi_reduction <add>, %27, %cst_6 [1, 2] : vector<1x7x16xf32> to vector<1xf32>
    %29 = vector.shape_cast %28 : vector<1xf32> to vector<1x1x1xf32>
    %30 = vector.extract %29[0, 0, 0] : f32 from vector<1x1x1xf32>
    %31 = arith.addf %22, %30 : f32
    %c0_7 = arith.constant 0 : index
    %c0_8 = arith.constant 0 : index
    %32 = memref.load %arg3[%c0_7, %c0_8] : memref<1x1xf32, #tpu.memory_space<smem>>
    memref.store %31, %arg3[%c0_7, %c0_8] : memref<1x1xf32, #tpu.memory_space<smem>>
    %c0_i32_9 = arith.constant 0 : i32
    %33 = arith.cmpi sgt, %arg0, %c0_i32_9 : i32
    %34 = arith.extui %33 : i1 to i32
    %c0_i32_10 = arith.constant 0 : i32
    %35 = arith.cmpi ne, %34, %c0_i32_10 : i32
    scf.if %35 {
      %41 = vector.extract_strided_slice %3 {offsets = [0, 0], sizes = [1, 32], strides = [1, 1]} : vector<8x32xf32> to vector<1x32xf32>
      %c0_15 = arith.constant 0 : index
      %c0_16 = arith.constant 0 : index
      %42 = vector.load %arg4[%c0_15, %c0_16] : memref<1x32xf32, #tpu.memory_space<vmem>>, vector<1x32xf32>
      %43 = arith.subf %41, %42 : vector<1x32xf32>
      %44 = arith.subf %43, %4 : vector<1x32xf32>
      %45 = arith.mulf %44, %44 : vector<1x32xf32>
      %46 = vector.extract_strided_slice %45 {offsets = [0, 0], sizes = [1, 16], strides = [1, 1]} : vector<1x32xf32> to vector<1x16xf32>
      %47 = vector.extract_strided_slice %45 {offsets = [0, 16], sizes = [1, 16], strides = [1, 1]} : vector<1x32xf32> to vector<1x16xf32>
      %48 = arith.addf %46, %47 : vector<1x16xf32>
      %c0_17 = arith.constant 0 : index
      %c0_18 = arith.constant 0 : index
      %49 = memref.load %arg3[%c0_17, %c0_18] : memref<1x1xf32, #tpu.memory_space<smem>>
      %50 = math.sqrt %48 : vector<1x16xf32>
      %51 = arith.mulf %48, %50 : vector<1x16xf32>
      %52 = vector.shape_cast %51 : vector<1x16xf32> to vector<1x1x16xf32>
      %cst_19 = arith.constant dense<0.000000e+00> : vector<1xf32>
      %53 = vector.multi_reduction <add>, %52, %cst_19 [1, 2] : vector<1x1x16xf32> to vector<1xf32>
      %54 = vector.shape_cast %53 : vector<1xf32> to vector<1x1x1xf32>
      %55 = vector.extract %54[0, 0, 0] : f32 from vector<1x1x1xf32>
      %56 = arith.addf %49, %55 : f32
      %c0_20 = arith.constant 0 : index
      %c0_21 = arith.constant 0 : index
      %57 = memref.load %arg3[%c0_20, %c0_21] : memref<1x1xf32, #tpu.memory_space<smem>>
      memref.store %56, %arg3[%c0_20, %c0_21] : memref<1x1xf32, #tpu.memory_space<smem>>
    } else {
    }
    %36 = vector.extract_strided_slice %3 {offsets = [7, 0], sizes = [1, 32], strides = [1, 1]} : vector<8x32xf32> to vector<1x32xf32>
    %c0_11 = arith.constant 0 : index
    %c0_12 = arith.constant 0 : index
    %37 = vector.load %arg4[%c0_11, %c0_12] : memref<1x32xf32, #tpu.memory_space<vmem>>, vector<1x32xf32>
    tpu.vector_store %arg4[%c0_11, %c0_12], %36 {strides = array<i32>} : memref<1x32xf32, #tpu.memory_space<vmem>>, vector<1x32xf32>,
    %c0_i32_13 = arith.constant 0 : i32
    %38 = arith.cmpi eq, %arg0, %c0_i32_13 : i32
    %39 = arith.extui %38 : i1 to i32
    %c0_i32_14 = arith.constant 0 : i32
    %40 = arith.cmpi ne, %39, %c0_i32_14 : i32
    scf.if %40 {
      %c0_15 = arith.constant 0 : index
      %c0_16 = arith.constant 0 : index
      %41 = memref.load %arg3[%c0_15, %c0_16] : memref<1x1xf32, #tpu.memory_space<smem>>
      %cst_17 = arith.constant 0.00142857141 : f32
      %42 = arith.mulf %41, %cst_17 : f32
      %c0_18 = arith.constant 0 : index
      %c0_19 = arith.constant 0 : index
      %43 = memref.load %arg3[%c0_18, %c0_19] : memref<1x1xf32, #tpu.memory_space<smem>>
      memref.store %42, %arg3[%c0_18, %c0_19] : memref<1x1xf32, #tpu.memory_space<smem>>
    } else {
    }
    return
  }
  func.func @transform_0(%arg0: i32) -> (i32, i32) {
    %c0_i32 = arith.constant 0 : i32
    %c0_i32_0 = arith.constant 0 : i32
    return %arg0, %c0_i32 : i32, i32
  }
  func.func @transform_1(%arg0: i32) -> (i32, i32) {
    %c0_i32 = arith.constant 0 : i32
    %c0_i32_0 = arith.constant 0 : i32
    %c0_i32_1 = arith.constant 0 : i32
    return %c0_i32, %c0_i32_0 : i32, i32
  }
  func.func @transform_2(%arg0: i32) -> (i32, i32) {
    %c0_i32 = arith.constant 0 : i32
    %c0_i32_0 = arith.constant 0 : i32
    %c0_i32_1 = arith.constant 0 : i32
    return %c0_i32, %c0_i32_0 : i32, i32
  }
}

</mosaic_0001>

<bundles_post_ra>
// kernel: tpu_custom_call.1
= control target key start
LH: loop header
LB: loop body
LE: loop exit
PB: predicated region body
PF: predicated region fallthrough
CT: control target
= control target key end

     0   :  { %7 = vsyncpa [#allocation4], 0  ;;  %s209_s0 = inlined_call_operand.hbm [shape: f32[8,32], index: 0, kind: input, shape index: {}]   ;;  %s210_s1 = inlined_call_operand.vmem [shape: f32[1,32], index: 1, kind: input, shape index: {}]   ;;  %s211_s2 = inlined_call_operand.hbm [shape: f32[1,1], index: 2, kind: output, shape index: {}]  }
   0x1   :  { %8 = vsyncpa [#allocation5], 0  ;;  %s182_s9 = smov [#allocation3]  }
   0x2   :  { %s15_s10 = sshll.u32 %s182_s9, 4  ;;  %s16_s10 = int_to_ptr.vmem [resolvable:$true] %s15_s10 }
   0x3   :  { %s158_s11 = scalar_lea.vmem %s16_s10, 128  ;;  %p163_p1 = scmp.lt.s32.totalorder %s16_s10, %s16_s10 }
   0x4   :  { %p159_p0 = scmp.ne.s32.totalorder %s16_s10, %s158_s11  ;;  %p164_p2 = scmp.lt.s32.totalorder %s158_s11, %s158_s11 }
   0x6   :  { %p165_p3 = por %p164_p2, %p163_p1 }
   0x8   :  { %p166_p4 = pnand %p165_p3, %p159_p0 }
   0xa   :  { %169 = shalt.err (!%p166_p4)
}
   0xb   :  { %18 = dma.hbm_to_vmem [thread:$0]  %s209_s0, 128, %s16_s10, [#allocation4]  }
   0xc   :  { %178 = dma.done.wait [#allocation4], 128  }
   0xd   :  { %179 = vsyncadd [#allocation4], 4294967168  ;;  %v30_v0 = vld [vmem:[#allocation3] sm:$0xff]  ;;  %s183_s16 = smov 112   ;;  %v58_v8 = vlaneseq  ;;  %vm70_vm3 = vcmask 129024   ;;  %s184_s17 = smov [#allocation6]  }
   0xe   :  { %v34_v1 = vrot.slane %v30_v0, 7  ;;  %v141_v2 = vld [vmem:[%s210_s1] ss:$0 sm:$0xff] }
   0xf   :  { %v59_v12 = vshrl.u32 %v58_v8, 7 }
  0x10   :  { %v36_v3 = vsub.f32 %v30_v0, %v34_v1 }
  0x11   :  { %vm62_vm2 = vcmp.lt.s32.totalorder %v59_v12, 7 }
  0x12   :  { %v43_v4 = vsub.f32 %v36_v3, %v141_v2 }
  0x14   :  { %v44_v5 = vmul.f32 %v43_v4, %v43_v4 }
  0x16   :  { %46 = vrot.lane.b32.xlu0 %v44_v5, %s183_s16 }
  0x88   :  { %v47_v6 = vpop.permute.xlu0 %46 }
  0x89   :  { %v49_v7 = vadd.f32 %v47_v6, %v44_v5 }
  0x8b   :  { %148 = vrsqrt.f32 %v49_v7  ;;  %vm52_vm0 = vcmp.eq.f32.partialorder %v49_v7, inf  ;;  %v55_v11 = vand.u32 2147483648, %v49_v7  ;;  %vm54_vm1 = vcmp.eq.f32.partialorder %v49_v7, 0.0 }
  0x98   :  { %v149_v9 = vpop.eup %148 }
  0x99   :  { %v51_v10 = vmul.f32 %v149_v9, %v49_v7 }
  0x9b   :  { %v53_v13 = vsel %vm52_vm0, %v49_v7, %v51_v10 }
  0x9c   :  { %v56_v14 = vsel %vm54_vm1, %v55_v11, %v53_v13 }
  0x9d   :  { %v57_v15 = vmul.f32 %v56_v14, %v49_v7 }
  0x9f   :  { %v67_v16 = vrot.slane %v57_v15, 1 }
  0xa1   :  { %v69_v17 = vsel %vm62_vm2, %v67_v16, 0.0 }
  0xa2   :  { %v71_v18 = vsel %vm70_vm3, %v69_v17, 0.0 }
  0xa3   :  { %72 = vadd.xlane.f32.xlu0 %v71_v18 }
 0x12c   :  { %v73_v19 = vpop.xlane.xlu0 %72 }
 0x12d   :  { %v74_v20 = vrot.slane %v73_v19, 4 }
 0x12f   :  { %v75_v21 = vadd.f32 %v74_v20, %v73_v19 }
 0x131   :  { %v76_v22 = vrot.slane %v75_v21, 2 }
 0x133   :  { %v77_v23 = vadd.f32 %v76_v22, %v75_v21 }
 0x135   :  { %v78_v24 = vrot.slane %v77_v23, 1 }
 0x137   :  { %v79_v25 = vadd.f32 %v78_v24, %v77_v23 }
 0x139   :  { %142 = vpush %v79_v25 }
 0x16a   :  { %s143_s0 = spop %142 }
 0x16b   :  { %s125_s1 = smul.f32 0.0014285714, %s143_s0 }
 0x16d   :  { %126 = sst [smem:[#allocation6]] %s125_s1 }
 0x16e   :  { %134 = dma.smem_to_hbm %s184_s17, 16, %s211_s2, [#allocation5]  }
 0x16f   :  { %180 = dma.done.wait [#allocation5], 16  }
 0x170   :  { %181 = vsyncadd [#allocation5], 4294967280 }
 0x171   :  { %138 = sfence }
 0x172   :  { %139 = vsyncpa [#allocation4], 1 }
 0x173   :  { %140 = vsyncpa [#allocation5], 1 }

</bundles_post_ra>
